<compile_context>
chip_gen: v6e
topology: v6e:2x2x1
jax: 0.10.0
libtpu: 0.0.40
codegen_flags: <defaults>
</compile_context>

<pallas_src>
import functools

import jax
import jax.numpy as jnp
from jax.experimental import pallas as pl
from jax.experimental.pallas import tpu as pltpu


def _round_up(x, m):
    return (x + m - 1) // m * m


def _tensorcores_per_chip():
    """1 for single-TC parts (v5e/v6e); 2 otherwise (v7x, megacore v4/v5p)."""
    try:
        kind = jax.devices()[0].device_kind.lower()
    except Exception:
        return 2
    single_tc = ("v5 lite", "v5e", "v5litepod", "v6 lite", "v6e")
    return 1 if any(m in kind for m in single_tc) else 2


def _choose_tile_rows(n_rows, cap_rows, prefer_even_tiles):
    """Pick TM (multiple of 8, <= cap) avoiding a full-dataset pad if possible."""
    cap = max(8, (cap_rows // 8) * 8)
    n8 = _round_up(n_rows, 8)
    if n8 <= cap:
        # Whole dataset fits in one tile; split in two balanced tiles on
        # multi-TC chips so both TensorCores get work.
        if prefer_even_tiles and n_rows == n8 and n_rows % 16 == 0 and n_rows >= 16:
            return n_rows // 2
        return n8
    # n_rows > cap: look for a divisor of n_rows in [cap/2, cap] (no padding).
    divs = [d for d in range(cap, cap // 2 - 1, -8) if n_rows % d == 0]
    if divs:
        if prefer_even_tiles:
            even = [d for d in divs if (n_rows // d) % 2 == 0]
            if even:
                return even[0]
        return divs[0]
    return cap  # fall back to padding the tail


def _eval_epoch_kernel(x_ref, y_ref, w_ref, b_ref, out_ref, *,
                       n_rows, tile_rows, needs_mask, accumulate):
    # x_ref: (TM, F)           y_ref: (TM, 1) i32
    # w_ref: (F, Cp)           b_ref: (1, Cp) f32   (Cp = classes padded to 128k)
    # out_ref: (1, 8, 128) f32 — loss partial in sublanes 0-3, correct-count
    #                            partial in sublanes 4-7.
    step = pl.program_id(0)
    TM = tile_rows
    Cp = w_ref.shape[1]

    x = x_ref[...]                                                      # (TM, F)
    y = y_ref[...]                                                      # (TM, 1)

    # model(x): linear classifier on the MXU, f32 accumulation.
    logits = jnp.dot(x, w_ref[...], preferred_element_type=jnp.float32) + b_ref[...]

    # criterion: CrossEntropyLoss with integer targets, per-row (no mean yet).
    max_l = jnp.max(logits, axis=1, keepdims=True)                      # (TM, 1)
    lse = jnp.log(jnp.sum(jnp.exp(logits - max_l), axis=1, keepdims=True)) + max_l
    cls = jax.lax.broadcasted_iota(jnp.int32, (TM, Cp), 1)              # (TM, Cp)
    one_hot = cls == y
    picked = jnp.sum(jnp.where(one_hot, logits, 0.0), axis=1, keepdims=True)
    loss_row = lse - picked                                             # (TM, 1)

    # softmax(dim=1).argmax(dim=1) == argmax(logits); the true class is the
    # prediction iff its logit equals the row max.  (Differs from torch only on
    # exact float ties.)  Saves a (TM,Cp) compare/where and an XLU lane-reduce.
    corr_row = (picked >= max_l).astype(jnp.float32)                    # (TM, 1)

    if needs_mask:
        # Only the final tile can be partial; jnp.where keeps NaN/garbage in
        # padded rows from poisoning the sums.
        is_last = step == pl.num_programs(0) - 1
        row = step * TM + jax.lax.broadcasted_iota(jnp.int32, (TM, 1), 0)
        valid = jnp.logical_or(jnp.logical_not(is_last), row < n_rows)
        loss_row = jnp.where(valid, loss_row, 0.0)
        corr_row = jnp.where(valid, corr_row, 0.0)

    loss_p = jnp.sum(loss_row)                                          # scalar
    corr_p = jnp.sum(corr_row)                                          # scalar

    # Merged lane-dense partial tile: one unmasked 4 KiB store per block.
    sub = jax.lax.broadcasted_iota(jnp.int32, (1, 8, 128), 1)
    tile = jnp.where(sub < 4, loss_p, corr_p)                           # (1,8,128)

    if accumulate:
        # Resident accumulator (single-TC chips): zero per-block HBM writeback.
        @pl.when(step == 0)
        def _():
            out_ref[...] = jnp.zeros_like(out_ref)
        out_ref[...] += tile
    else:
        # Per-block partials (multi-TC chips): independent -> "parallel" grid.
        out_ref[...] = tile


def eval_epoch(xs, ys, w, b, *, tile_rows=1024, x_dtype=None):
    """Returns (average_accuracy, average_loss) over all batches.

    xs: (NB, B, F) f32, ys: (NB, B, 1) int, w: (F, C), b: (1, C).
    x_dtype: optionally stream x/W in a narrower dtype (e.g. jnp.bfloat16);
             MXU still accumulates in f32 and all loss math stays f32.
    """
    NB, B, F = xs.shape
    C = w.shape[1]
    N = NB * B

    # Fuse the batch loop into the row dimension.
    x2 = xs.reshape(N, F)
    y2 = ys.reshape(N, 1).astype(jnp.int32)
    if x_dtype is not None:
        x2 = x2.astype(x_dtype)
        w = w.astype(x_dtype)
    x_isz = jnp.dtype(x2.dtype).itemsize
    w_isz = jnp.dtype(w.dtype).itemsize

    # Lane-pad the class dimension to a multiple of 128.  Padded class lanes
    # get a huge negative bias so they never win the max and contribute ~0 to
    # the log-sum-exp.  Labels must satisfy 0 <= y < C.
    Cp = _round_up(max(C, 128), 128)
    if Cp > C:
        w_pad = jnp.pad(w, ((0, 0), (0, Cp - C)))
        b_pad = jnp.concatenate(
            [b.astype(jnp.float32),
             jnp.full((1, Cp - C), -1e30, dtype=jnp.float32)], axis=1)
    else:
        w_pad = w
        b_pad = b.astype(jnp.float32)

    multi_tc = _tensorcores_per_chip() >= 2
    accumulate = not multi_tc

    # --- VMEM budgeting: grow TM until the double-buffered working set fills
    # a conservative budget (safe on v7x's 64 MiB physical VMEM). ---
    # TODO(synk): the (TM,1) i32 label block lane-pads to (TM,128) in VMEM; a
    # lane-dense label packing would shrink this if the kernel is generalized.
    w_bytes_total = F * Cp * w_isz
    w_nbuf = 1 if w_bytes_total > (4 << 20) else 2   # single-buffer big W (v7x)
    bytes_per_row = 2 * F * x_isz + 2 * 128 * 4      # dbl-buffered x + padded y
    fixed = w_nbuf * w_bytes_total + 2 * Cp * 4 + 2 * 8 * 128 * 4 + (1 << 20)
    budget = 24 << 20
    cap_rows = max(8, min(int(tile_rows), (budget - fixed) // bytes_per_row))
    TM = _choose_tile_rows(N, cap_rows, prefer_even_tiles=multi_tc)

    Npad = _round_up(N, TM)
    num_tiles = Npad // TM
    needs_mask = Npad != N
    if needs_mask:
        # Padding fallback only (TM divides N whenever feasible).
        x2 = jnp.pad(x2, ((0, Npad - N), (0, 0)))
        y2 = jnp.pad(y2, ((0, Npad - N), (0, 0)))

    needed = (2 * TM * F * x_isz + 2 * TM * 128 * 4
              + w_nbuf * w_bytes_total + 2 * Cp * 4 + 2 * 8 * 128 * 4)
    vmem_limit = int(min(max(2 * needed, 32 << 20), 48 << 20))

    w_spec_kwargs = {}
    if w_nbuf == 1:
        # Constant index_map -> no perf cost to single-buffering; halves the
        # resident-W footprint where VMEM is tight.
        w_spec_kwargs = dict(pipeline_mode=pl.Buffered(1))

    if accumulate:
        out_tiles = 1
        out_spec = pl.BlockSpec((1, 8, 128), lambda i: (0, 0, 0))
        semantics = ("arbitrary",)
    else:
        out_tiles = num_tiles
        out_spec = pl.BlockSpec((1, 8, 128), lambda i: (i, 0, 0))
        semantics = ("parallel",)

    kernel = functools.partial(
        _eval_epoch_kernel,
        n_rows=N, tile_rows=TM, needs_mask=needs_mask, accumulate=accumulate)

    part = pl.pallas_call(
        kernel,
        out_shape=jax.ShapeDtypeStruct((out_tiles, 8, 128), jnp.float32),
        grid_spec=pltpu.PrefetchScalarGridSpec(
            num_scalar_prefetch=0,
            grid=(num_tiles,),
            in_specs=[
                pl.BlockSpec((TM, F), lambda i: (i, 0)),                 # x rows
                pl.BlockSpec((TM, 1), lambda i: (i, 0)),                 # labels
                pl.BlockSpec((F, Cp), lambda i: (0, 0), **w_spec_kwargs),  # W
                pl.BlockSpec((1, Cp), lambda i: (0, 0)),                 # b
            ],
            out_specs=out_spec,
        ),
        compiler_params=pltpu.CompilerParams(
            dimension_semantics=semantics,
            vmem_limit_bytes=vmem_limit,
        ),
    )(x2, y2, w_pad, b_pad)

    # Tiny final reduction (f32; for N >~ 2^24 rows a wider accumulation would
    # be needed).  Equal batch sizes => mean-of-per-batch-means == row mean.
    total_loss = jnp.sum(part[:, 0, 0])
    total_corr = jnp.sum(part[:, 4, 0])
    return total_corr / N, total_loss / N


def _reference(xs, ys, w, b):
    """Pure-JAX reference mirroring the PyTorch eval loop."""
    NB, B, _ = xs.shape
    accs, losses = [], []
    for i in range(NB):
        logits = xs[i] @ w + b                                  # (B, C)
        lse = jax.scipy.special.logsumexp(logits, axis=1)       # (B,)
        y = ys[i, :, 0]
        picked = logits[jnp.arange(B), y]
        losses.append(jnp.mean(lse - picked))
        pred = jnp.argmax(logits, axis=1)
        accs.append(jnp.mean((pred == y).astype(jnp.float32)))
    return (sum(accs) / NB, sum(losses) / NB)


if __name__ == "__main__":
    NB, B, F, C = 7, 48, 32, 10   # num_batches, batch, features, classes

    key = jax.random.PRNGKey(0)
    kx, ky, kw, kb = jax.random.split(key, 4)

    xs = jax.random.normal(kx, (NB, B, F), dtype=jnp.float32)
    ys = jax.random.randint(ky, (NB, B, 1), 0, C, dtype=jnp.int32)
    w = 0.1 * jax.random.normal(kw, (F, C), dtype=jnp.float32)
    b = 0.01 * jax.random.normal(kb, (1, C), dtype=jnp.float32)

    # 1) Main path (no padding needed: TM divides 336 rows).
    avg_acc, avg_loss = eval_epoch(xs, ys, w, b)
    jax.block_until_ready((avg_acc, avg_loss))
    ref_acc, ref_loss = _reference(xs, ys, w, b)
    assert jnp.allclose(avg_acc, ref_acc, atol=1e-5), (avg_acc, ref_acc)
    assert jnp.allclose(avg_loss, ref_loss, atol=1e-5), (avg_loss, ref_loss)

    # 2) Ragged total-row-count path (65 rows -> padded/masked final tile).
    NB2, B2 = 5, 13
    xs2 = jax.random.normal(kx, (NB2, B2, F), dtype=jnp.float32)
    ys2 = jax.random.randint(ky, (NB2, B2, 1), 0, C, dtype=jnp.int32)
    acc2, loss2 = eval_epoch(xs2, ys2, w, b)
    jax.block_until_ready((acc2, loss2))
    ref_acc2, ref_loss2 = _reference(xs2, ys2, w, b)
    assert jnp.allclose(acc2, ref_acc2, atol=1e-5), (acc2, ref_acc2)
    assert jnp.allclose(loss2, ref_loss2, atol=1e-5), (loss2, ref_loss2)

    # 3) Optional bf16 streaming of x/W (halves HBM traffic); loose tolerance
    #    against the f32 reference since inputs are rounded to bf16.
    acc3, loss3 = eval_epoch(xs, ys, w, b, x_dtype=jnp.bfloat16)
    jax.block_until_ready((acc3, loss3))
    assert jnp.allclose(acc3, ref_acc, atol=2e-2), (acc3, ref_acc)
    assert jnp.allclose(loss3, ref_loss, atol=5e-2), (loss3, ref_loss)

    print("KERNEL_OK")
</pallas_src>

<mosaic_0001>
module attributes {stable_mosaic.version = 11 : i64} {
  func.func @_eval_epoch_kernel(%arg0: i32, %arg1: memref<168x32xf32, #tpu.memory_space<vmem>>, %arg2: memref<168x1xi32, #tpu.memory_space<vmem>>, %arg3: memref<32x128xf32, #tpu.memory_space<vmem>>, %arg4: memref<1x128xf32, #tpu.memory_space<vmem>>, %arg5: memref<1x8x128xf32, #tpu.memory_space<vmem>>) attributes {dimension_semantics = [#tpu.dimension_semantics<parallel>], iteration_bounds = array<i64: 2>, scalar_prefetch = 0 : i64, scratch_operands = 0 : i64, tpu.core_type = #tpu.core_type<tc>, window_params = [{transform_indices = @transform_0, window_bounds = array<i64: 168, 32>}, {transform_indices = @transform_1, window_bounds = array<i64: 168, 1>}, {pipeline_mode = #tpu.pipeline_mode<synchronous>, transform_indices = @transform_2, window_bounds = array<i64: 32, 128>}, {pipeline_mode = #tpu.pipeline_mode<synchronous>, transform_indices = @transform_3, window_bounds = array<i64: 1, 128>}, {transform_indices = @transform_4, window_bounds = array<i64: 1, 8, 128>}]} {
    %c0 = arith.constant 0 : index
    %c0_0 = arith.constant 0 : index
    %0 = vector.load %arg1[%c0, %c0_0] : memref<168x32xf32, #tpu.memory_space<vmem>>, vector<168x32xf32>
    %c0_1 = arith.constant 0 : index
    %c0_2 = arith.constant 0 : index
    %1 = vector.load %arg2[%c0_1, %c0_2] : memref<168x1xi32, #tpu.memory_space<vmem>>, vector<168x1xi32>
    %c0_3 = arith.constant 0 : index
    %c0_4 = arith.constant 0 : index
    %2 = vector.load %arg3[%c0_3, %c0_4] : memref<32x128xf32, #tpu.memory_space<vmem>>, vector<32x128xf32>
    %cst = arith.constant dense<0.000000e+00> : vector<168x128xf32>
    %3 = tpu.matmul %0, %2, %cst {dimension_numbers = #tpu.dot_dimension_numbers<[1], [0], [0], [1], [0, 0, 1, 1], [], []>} : vector<168x32xf32>, vector<32x128xf32>, vector<168x128xf32> -> vector<168x128xf32>
    %c0_5 = arith.constant 0 : index
    %c0_6 = arith.constant 0 : index
    %4 = vector.load %arg4[%c0_5, %c0_6] : memref<1x128xf32, #tpu.memory_space<vmem>>, vector<1x128xf32>
    %5 = vector.broadcast %4 : vector<1x128xf32> to vector<168x128xf32>
    %6 = arith.addf %3, %5 : vector<168x128xf32>
    %cst_7 = arith.constant dense<0xFF800000> : vector<168xf32>
    %7 = vector.multi_reduction <maximumf>, %6, %cst_7 [1] : vector<168x128xf32> to vector<168xf32>
    %8 = vector.shape_cast %7 : vector<168xf32> to vector<168x1xf32>
    %9 = vector.broadcast %8 : vector<168x1xf32> to vector<168x128xf32>
    %10 = arith.subf %6, %9 : vector<168x128xf32>
    %11 = math.exp %10 : vector<168x128xf32>
    %cst_8 = arith.constant dense<0.000000e+00> : vector<168xf32>
    %12 = vector.multi_reduction <add>, %11, %cst_8 [1] : vector<168x128xf32> to vector<168xf32>
    %13 = vector.shape_cast %12 : vector<168xf32> to vector<168x1xf32>
    %14 = math.log %13 : vector<168x1xf32>
    %15 = arith.addf %14, %8 : vector<168x1xf32>
    %16 = tpu.iota {dimensions = array<i32: 1>} : vector<168x128xi32>
    %17 = vector.broadcast %1 : vector<168x1xi32> to vector<168x128xi32>
    %18 = arith.cmpi eq, %16, %17 : vector<168x128xi32>
    %cst_9 = arith.constant 0.000000e+00 : f32
    %19 = vector.broadcast %cst_9 : f32 to vector<168x128xf32>
    %20 = arith.select %18, %6, %19 : vector<168x128xi1>, vector<168x128xf32>
    %cst_10 = arith.constant dense<0.000000e+00> : vector<168xf32>
    %21 = vector.multi_reduction <add>, %20, %cst_10 [1] : vector<168x128xf32> to vector<168xf32>
    %22 = vector.shape_cast %21 : vector<168xf32> to vector<168x1xf32>
    %23 = arith.subf %15, %22 : vector<168x1xf32>
    %24 = arith.cmpf oge, %22, %8 : vector<168x1xf32>
    %25 = arith.extui %24 : vector<168x1xi1> to vector<168x1xi32>
    %26 = arith.sitofp %25 : vector<168x1xi32> to vector<168x1xf32>
    %27 = vector.shape_cast %23 : vector<168x1xf32> to vector<1x168x1xf32>
    %cst_11 = arith.constant dense<0.000000e+00> : vector<1xf32>
    %28 = vector.multi_reduction <add>, %27, %cst_11 [1, 2] : vector<1x168x1xf32> to vector<1xf32>
    %29 = vector.shape_cast %28 : vector<1xf32> to vector<1x1x1xf32>
    %30 = vector.extract %29[0, 0, 0] : f32 from vector<1x1x1xf32>
    %31 = vector.shape_cast %26 : vector<168x1xf32> to vector<1x168x1xf32>
    %cst_12 = arith.constant dense<0.000000e+00> : vector<1xf32>
    %32 = vector.multi_reduction <add>, %31, %cst_12 [1, 2] : vector<1x168x1xf32> to vector<1xf32>
    %33 = vector.shape_cast %32 : vector<1xf32> to vector<1x1x1xf32>
    %34 = vector.extract %33[0, 0, 0] : f32 from vector<1x1x1xf32>
    %35 = tpu.iota {dimensions = array<i32: 1>} : vector<1x8x128xi32>
    %c4_i32 = arith.constant 4 : i32
    %36 = vector.broadcast %c4_i32 : i32 to vector<1x8x128xi32>
    %37 = arith.cmpi slt, %35, %36 : vector<1x8x128xi32>
    %38 = vector.broadcast %30 : f32 to vector<1x8x128xf32>
    %39 = vector.broadcast %34 : f32 to vector<1x8x128xf32>
    %40 = arith.select %37, %38, %39 : vector<1x8x128xi1>, vector<1x8x128xf32>
    %c0_13 = arith.constant 0 : index
    %c0_14 = arith.constant 0 : index
    %c0_15 = arith.constant 0 : index
    %41 = vector.load %arg5[%c0_13, %c0_14, %c0_15] : memref<1x8x128xf32, #tpu.memory_space<vmem>>, vector<1x8x128xf32>
    tpu.vector_store %arg5[%c0_13, %c0_14, %c0_15], %40 {strides = array<i32>} : memref<1x8x128xf32, #tpu.memory_space<vmem>>, vector<1x8x128xf32>,
    return
  }
  func.func @transform_0(%arg0: i32) -> (i32, i32) {
    %c0_i32 = arith.constant 0 : i32
    %c0_i32_0 = arith.constant 0 : i32
    return %arg0, %c0_i32 : i32, i32
  }
  func.func @transform_1(%arg0: i32) -> (i32, i32) {
    %c0_i32 = arith.constant 0 : i32
    %c0_i32_0 = arith.constant 0 : i32
    return %arg0, %c0_i32 : i32, i32
  }
  func.func @transform_2(%arg0: i32) -> (i32, i32) {
    %c0_i32 = arith.constant 0 : i32
    %c0_i32_0 = arith.constant 0 : i32
    %c0_i32_1 = arith.constant 0 : i32
    return %c0_i32, %c0_i32_0 : i32, i32
  }
  func.func @transform_3(%arg0: i32) -> (i32, i32) {
    %c0_i32 = arith.constant 0 : i32
    %c0_i32_0 = arith.constant 0 : i32
    %c0_i32_1 = arith.constant 0 : i32
    return %c0_i32, %c0_i32_0 : i32, i32
  }
  func.func @transform_4(%arg0: i32) -> (i32, i32, i32) {
    %c0_i32 = arith.constant 0 : i32
    %c0_i32_0 = arith.constant 0 : i32
    %c0_i32_1 = arith.constant 0 : i32
    return %arg0, %c0_i32, %c0_i32_0 : i32, i32, i32
  }
}

</mosaic_0001>

<bundles_post_ra>
// kernel: tpu_custom_call.1
= control target key start
LH: loop header
LB: loop body
LE: loop exit
PB: predicated region body
PF: predicated region fallthrough
CT: control target
= control target key end

     0   :  { %9 = vsyncpa [#allocation3], 0  ;;  %s2132_s0 = inlined_call_operand.vmem [shape: f32[336,32], index: 0, kind: input, shape index: {}]   ;;  %s2133_s1 = inlined_call_operand.vmem [shape: s32[336,1], index: 1, kind: input, shape index: {}]   ;;  %s2134_s2 = inlined_call_operand.vmem [shape: f32[32,128], index: 2, kind: input, shape index: {}]   ;;  %s2135_s3 = inlined_call_operand.vmem [shape: f32[1,128], index: 3, kind: input, shape index: {}]   ;;  %s2136_s4 = inlined_call_operand.hbm [shape: f32[2,8,128], index: 4, kind: output, shape index: {}]  }
   0x1   :  { %11 = vsyncpa [#allocation3 + $0x1], 0  ;;  %s1524_s15 = smov 0   ;;  %s1526_s16 = smov 0  }
   0x2   :  { %s1528_s17 = smov 0   ;;  %s1530_s18 = smov 0  }
   0x3 LB: > { %s1545_s19 = sadd.s32 4294967295, %s1493_s18   ;;  %s1143_s20 = sadd.s32 4294967294, %s1493_s18   ;;  %s1493_s18 = sphi %s1530_s18, %s2142_s18   ;;  %s1489_s17 = sphi %s1528_s17, %s2141_s17   ;;  %s1485_s16 = sphi %s1526_s16, %s2140_s16   ;;  %s1481_s15 = sphi %s1524_s15, %s2139_s15  }
   0x4   : > { %s1549_s21 = sadd.s32 1, %s1493_s18   ;;  %s118_s22 = sadd.s32 1, %s1489_s17 }
   0x5   : > { %s115_s23 = ssub.s32 %s1493_s18, %s1549_s21  ;;  %p128_p0 = scmp.ne.s32.totalorder %s1489_s17, %s1485_s16 }
   0x6   : > { %p116_p1 = scmp.eq.s32.totalorder %s115_s23, 0  ;;  %p129_p2 = scmp.eq.s32.totalorder %s1545_s19, 1 }
   0x7   : > { %p134_p3 = scmp.ne.s32.totalorder %s1485_s16, %s1481_s15  ;;  %p135_p4 = scmp.eq.s32.totalorder %s1143_s20, 1 }
   0x8   : > { %s1560_s24 = scalar_select %p116_p1, %s1489_s17, %s118_s22  }
   0x9   : > { %p1562_p5 = por %p129_p2, %p128_p0  ;;  %p1566_p6 = por %p135_p4, %p134_p3 }
   0xa   : > { %p1146_p7 = scmp.ge.s32.totalorder %s1493_s18, 1  ;;  %p177_p8 = scmp.lt.s32.totalorder %s1493_s18, 3 }
   0xc   : > { %p178_p9 = pnand %p1146_p7, %p177_p8 }
   0xd   : > { %s208_s29 = smul.u32 (!%p178_p9), 21, %s1545_s19  ;;  %s205_s28 = sand.u32 (!%p178_p9), 1, %s1485_s16  }
   0xe   : > { %181 = sbr.rel (%p178_p9) target bundleno = 819 (0x333), region = 36  ;;  %s1194_s30 = sshll.u32 (!%p178_p9), %s1545_s19, 7 }
   0xf   : > { %p209_p10 = scmp.lt.s32.totalorder (!%p178_p9), %s208_s29, 41  ;;  %s2097_s11 = scalar_lea.hbm (!%p178_p9), %s2136_s4, %s1194_s30 }
  0x10   : > { %s1059_s12 = scalar_lea.sflag (!%p178_p9), [#allocation3], %s205_s28  ;;  %s1498_s19 = smov (!%p178_p9), [#allocation2]  }
  0x11   : > { %s1437_s14 = sshll.u32 (!%p178_p9), %s1498_s19, 4  ;;  %s1438_s14 = int_to_ptr.vmem [resolvable:$false] %s1437_s14 }
  0x12   : > { %s1439_s20 = scalar_lea.vmem (!%p178_p9), %s1438_s14, 256 }
  0x13   : > { %v265_v0 = vld [vmem:[%s2134_s2 + $0x18] sm:$0xff]  ;;  %v1495_v1 = vmov 0.0   ;;  %v264_v2 = vld [vmem:[%s2134_s2 + $0x10] sm:$0xff]  ;;  %v263_v3 = vld [vmem:[%s2134_s2 + $0x8] sm:$0xff]  ;;  %s2144_s29 = smov (!%p209_p10, %s208_s29), 41  ;;  %vm273_vm0 = vcmask 261120  }
  0x14   : > { %1222 = vmatprep.subr.mxu0 %v1495_v1  ;;  %1293 = vmatprep.subr.mxu1 %v1495_v1  ;;  %v262_v4 = vld [vmem:[%s2134_s2] sm:$0xff]  ;;  %s1148_s10 = sshll.u32 %s2144_s29, 3  ;;  %vm1496_vm1 = vmmov 0   ;;  %v1497_v9 = vmov 0   ;;  %s1147_s29 = sshll.u32 %s205_s28, 3 }
  0x15   : > { %1223 = vmatpush3.msra.mxu0 %v265_v0  ;;  %1297 = vmatpush3.msra.mxu1 %v265_v0  ;;  %s1596_s13 = scalar_lea.vmem %s2132_s0, %s1148_s10  ;;  %s1615_s22 = scalar_lea.vmem %s2133_s1, %s1148_s10  ;;  %v1709_v46 = vld [vmem:[%s2135_s3] ss:$0 sm:$0xff] }
  0x16   : > { %1224 = vmatprep.subr.mxu0 %v1495_v1  ;;  %1294 = vmatprep.subr.mxu1 %v1495_v1  ;;  %v220_v5 = vld [vmem:[%s1596_s13] sm:$0xff]  ;;  %v231_v6 = vld [vmem:[%s1596_s13 + $0x58] sm:$0xff]  ;;  %v221_v7 = vld [vmem:[%s1596_s13 + $0x8] sm:$0xff]  ;;  %s207_s5 = scalar_lea.vmem [#allocation2], %s1147_s29 }
  0x17   : > { %1225 = vmatpush3.msra.mxu0 %v264_v2  ;;  %1298 = vmatpush3.msra.mxu1 %v264_v2  ;;  %v232_v8 = vld [vmem:[%s1596_s13 + $0x60] sm:$0xff]  ;;  %v222_v11 = vld [vmem:[%s1596_s13 + $0x10] sm:$0xff]  ;;  %v233_v12 = vld [vmem:[%s1596_s13 + $0x68] sm:$0xff]  ;;  %s1072_s6 = sshll.u32 %s207_s5, 4  ;;  %s1073_s6 = int_to_ptr.vmem [resolvable:$true] %s1072_s6 }
  0x18   : > { %1226 = vmatprep.subr.mxu0 %v1495_v1  ;;  %1295 = vmatprep.subr.mxu1 %v1495_v1  ;;  %v241_v10 = vld [vmem:[%s1615_s22] sm:$0xff]  ;;  %v243_v13 = vld [vmem:[%s1615_s22 + $0x10] sm:$0xff]  ;;  %v242_v14 = vld [vmem:[%s1615_s22 + $0x8] sm:$0xff]  ;;  %p1440_p0 = scmp.lt.s32.totalorder %s1073_s6, %s1438_s14 }
  0x19   : > { %1227 = vmatpush3.msra.mxu0 %v263_v3  ;;  %1299 = vmatpush3.msra.mxu1 %v263_v3  ;;  %v223_v15 = vld [vmem:[%s1596_s13 + $0x18] sm:$0xff]  ;;  %v234_v16 = vld [vmem:[%s1596_s13 + $0x70] sm:$0xff]  ;;  %v224_v19 = vld [vmem:[%s1596_s13 + $0x20] sm:$0xff] }
  0x1a   : > { %1228 = vmatprep.subr.mxu0 %v1495_v1  ;;  %1296 = vmatprep.subr.mxu1 %v1495_v1  ;;  %v244_v17 = vld [vmem:[%s1615_s22 + $0x18] sm:$0xff]  ;;  %v251_v18 = vld [vmem:[%s1615_s22 + $0x50] sm:$0xff]  ;;  %v245_v21 = vld [vmem:[%s1615_s22 + $0x20] sm:$0xff] }
  0x1b   : > { %1229 = vmatpush3.msra.mxu0 %v262_v4  ;;  %1300 = vmatpush3.msra.mxu1 %v262_v4  ;;  %v235_v20 = vld [vmem:[%s1596_s13 + $0x78] sm:$0xff]  ;;  %v253_v22 = vld [vmem:[%s1615_s22 + $0x60] sm:$0xff]  ;;  %v225_v23 = vld [vmem:[%s1596_s13 + $0x28] sm:$0xff] }
  0x1c   : > { %1230 = vmatprep.mubr.msk.f32.mxu0 %vm1496_vm1, %v1495_v1  ;;  %1263 = vmatprep.mubr.msk.f32.mxu1 %vm1496_vm1, %v1495_v1  ;;  %v236_v24 = vld [vmem:[%s1596_s13 + $0x80] sm:$0xff]  ;;  %v246_v25 = vld [vmem:[%s1615_s22 + $0x28] sm:$0xff]  ;;  %v255_v26 = vld [vmem:[%s1615_s22 + $0x70] sm:$0xff] }
  0x1d   : > { %1231 = vmatmul.mubr.msk.f32.vlgmr.msra.gmra.mxu0 %vm273_vm0, %v220_v5  ;;  %1264 = vmatmul.mubr.msk.f32.vlgmr.msra.gmra.mxu1 %vm273_vm0, %v231_v6  ;;  %v226_v27 = vld [vmem:[%s1596_s13 + $0x30] sm:$0xff]  ;;  %v237_v28 = vld [vmem:[%s1596_s13 + $0x88] sm:$0xff]  ;;  %v257_v30 = vld [vmem:[%s1615_s22 + $0x80] sm:$0xff] }
  0x1e   : > { %1233 = vmatprep.mubr.msk.f32.mxu0 %vm1496_vm1, %v1495_v1  ;;  %1266 = vmatprep.mubr.msk.f32.mxu1 %vm1496_vm1, %v1495_v1  ;;  %v247_v29 = vld [vmem:[%s1615_s22 + $0x30] sm:$0xff]  ;;  %v227_v31 = vld [vmem:[%s1596_s13 + $0x38] sm:$0xff]  ;;  %v228_v35 = vld [vmem:[%s1596_s13 + $0x40] sm:$0xff] }
  0x1f   : > { %1347 = vset.pattern.permute.xlu1 %v1497_v9  ;;  %1348 = vset.pattern.permute.xlu0 %v1497_v9  ;;  %v238_v32 = vld [vmem:[%s1596_s13 + $0x90] sm:$0xff]  ;;  %v248_v33 = vld [vmem:[%s1615_s22 + $0x38] sm:$0xff]  ;;  %v249_v37 = vld [vmem:[%s1615_s22 + $0x40] sm:$0xff] }
  0x20   : > { %720 = vperm.xlu1 %1347, %v241_v10   ;;  %723 = vperm.xlu0 %1348, %v242_v14   ;;  %v259_v34 = vld [vmem:[%s1615_s22 + $0x90] sm:$0xff]  ;;  %v239_v36 = vld [vmem:[%s1596_s13 + $0x98] sm:$0xff]  ;;  %v229_v38 = vld [vmem:[%s1596_s13 + $0x48] sm:$0xff] }
  0x21   : > { %1234 = vmatmul.mubr.msk.f32.gmra.mxu0 %vm273_vm0, %v221_v7  ;;  %1267 = vmatmul.mubr.msk.f32.gmra.mxu1 %vm273_vm0, %v232_v8  ;;  %v240_v39 = vld [vmem:[%s1596_s13 + $0xa0] sm:$0xff]  ;;  %v250_v40 = vld [vmem:[%s1615_s22 + $0x48] sm:$0xff]  ;;  %v230_v41 = vld [vmem:[%s1596_s13 + $0x50] sm:$0xff]  ;;  %s1433_s13 = scalar_lea.vmem %s1073_s6, 128 }
  0x22   : > { %1236 = vmatprep.mubr.msk.f32.mxu0 %vm1496_vm1, %v1495_v1  ;;  %1269 = vmatprep.mubr.msk.f32.mxu1 %vm1496_vm1, %v1495_v1  ;;  %v252_v42 = vld [vmem:[%s1615_s22 + $0x58] sm:$0xff]  ;;  %v254_v43 = vld [vmem:[%s1615_s22 + $0x68] sm:$0xff]  ;;  %p1434_p11 = scmp.ne.s32.totalorder %s1073_s6, %s1433_s13  ;;  %p1441_p1 = scmp.lt.s32.totalorder %s1439_s20, %s1433_s13 }
  0x23   : > { %v256_v44 = vld [vmem:[%s1615_s22 + $0x78] sm:$0xff]  ;;  %v258_v45 = vld [vmem:[%s1615_s22 + $0x88] sm:$0xff] }
  0x24   : > { %726 = vperm.xlu1 %1347, %v243_v13   ;;  %750 = vperm.xlu0 %1348, %v251_v18   ;;  %p1435_p12 = pnand %p1434_p11, %p1562_p5  ;;  %p1442_p2 = por %p1441_p1, %p1440_p0 }
  0x25   : > { %1237 = vmatmul.mubr.msk.f32.gmra.mxu0 %vm273_vm0, %v222_v11  ;;  %1270 = vmatmul.mubr.msk.f32.gmra.mxu1 %vm273_vm0, %v233_v12 }
  0x26   : > { %1239 = vmatprep.mubr.msk.f32.mxu0 %vm1496_vm1, %v1495_v1  ;;  %1272 = vmatprep.mubr.msk.f32.mxu1 %vm1496_vm1, %v1495_v1  ;;  %p1436_p13 = pneg %p1435_p12 }
  0x28   : > { %729 = vperm.xlu1 %1347, %v244_v17   ;;  %756 = vperm.xlu0 %1348, %v253_v22   ;;  %p1443_p3 = pnand %p1442_p2, %p1436_p13 }
  0x29   : > { %1240 = vmatmul.mubr.msk.f32.gmra.mxu0 %vm273_vm0, %v223_v15  ;;  %1273 = vmatmul.mubr.msk.f32.gmra.mxu1 %vm273_vm0, %v234_v16 }
  0x2a   : > { %1242 = vmatprep.mubr.msk.f32.mxu0 %vm1496_vm1, %v1495_v1  ;;  %1275 = vmatprep.mubr.msk.f32.mxu1 %vm1496_vm1, %v1495_v1 }
  0x2c   : > { %732 = vperm.xlu1 %1347, %v245_v21   ;;  %762 = vperm.xlu0 %1348, %v255_v26  }
  0x2d   : > { %1243 = vmatmul.mubr.msk.f32.gmra.mxu0 %vm273_vm0, %v224_v19  ;;  %1276 = vmatmul.mubr.msk.f32.gmra.mxu1 %vm273_vm0, %v235_v20 }
  0x2e   : > { %1245 = vmatprep.mubr.msk.f32.mxu0 %vm1496_vm1, %v1495_v1  ;;  %1278 = vmatprep.mubr.msk.f32.mxu1 %vm1496_vm1, %v1495_v1 }
  0x30   : > { %735 = vperm.xlu1 %1347, %v246_v25   ;;  %768 = vperm.xlu0 %1348, %v257_v30  }
  0x31   : > { %1246 = vmatmul.mubr.msk.f32.gmra.mxu0 %vm273_vm0, %v225_v23  ;;  %1279 = vmatmul.mubr.msk.f32.gmra.mxu1 %vm273_vm0, %v236_v24 }
  0x32   : > { %1248 = vmatprep.mubr.msk.f32.mxu0 %vm1496_vm1, %v1495_v1  ;;  %1281 = vmatprep.mubr.msk.f32.mxu1 %vm1496_vm1, %v1495_v1 }
  0x34   : > { %738 = vperm.xlu1 %1347, %v247_v29   ;;  %774 = vperm.xlu0 %1348, %v259_v34  }
  0x35   : > { %1249 = vmatmul.mubr.msk.f32.gmra.mxu0 %vm273_vm0, %v226_v27  ;;  %1282 = vmatmul.mubr.msk.f32.gmra.mxu1 %vm273_vm0, %v237_v28 }
  0x36   : > { %1251 = vmatprep.mubr.msk.f32.mxu0 %vm1496_vm1, %v1495_v1  ;;  %1284 = vmatprep.mubr.msk.f32.mxu1 %vm1496_vm1, %v1495_v1 }
  0x38   : > { %741 = vperm.xlu1 %1347, %v248_v33  }
  0x39   : > { %1252 = vmatmul.mubr.msk.f32.gmra.mxu0 %vm273_vm0, %v227_v31  ;;  %1285 = vmatmul.mubr.msk.f32.gmra.mxu1 %vm273_vm0, %v238_v32 }
  0x3a   : > { %1254 = vmatprep.mubr.msk.f32.mxu0 %vm1496_vm1, %v1495_v1  ;;  %1287 = vmatprep.mubr.msk.f32.mxu1 %vm1496_vm1, %v1495_v1 }
  0x3c   : > { %744 = vperm.xlu1 %1347, %v249_v37  }
  0x3d   : > { %1255 = vmatmul.mubr.msk.f32.gmra.mxu0 %vm273_vm0, %v228_v35  ;;  %1288 = vmatmul.mubr.msk.f32.gmra.mxu1 %vm273_vm0, %v239_v36 }
  0x3e   : > { %1257 = vmatprep.mubr.msk.f32.mxu0 %vm1496_vm1, %v1495_v1  ;;  %1290 = vmatprep.mubr.msk.f32.mxu1 %vm1496_vm1, %v1495_v1 }
  0x40   : > { %747 = vperm.xlu1 %1347, %v250_v40  }
  0x41   : > { %1258 = vmatmul.mubr.msk.f32.gmra.mxu0 %vm273_vm0, %v229_v38  ;;  %1291 = vmatmul.mubr.msk.f32.gmra.mxu1 %vm273_vm0, %v240_v39 }
  0x42   : > { %1260 = vmatprep.mubr.msk.f32.mxu0 %vm1496_vm1, %v1495_v1 }
  0x44   : > { %753 = vperm.xlu1 %1347, %v252_v42  }
  0x45   : > { %1261 = vmatmul.mubr.msk.f32.gmra.mxu0 %vm273_vm0, %v230_v41 }
  0x48   : > { %759 = vperm.xlu1 %1347, %v254_v43  }
  0x4c   : > { %765 = vperm.xlu1 %1347, %v256_v44  }
  0x50   : > { %771 = vperm.xlu1 %1347, %v258_v45  }
  0xdd   : > { %v403_v47 = vpop.f32.mrf.mxu0  ;;  %v458_v48 = vpop.f32.mrf.mxu1 }
  0xde   : > { %v1712_v49 = vadd.f32 %v1709_v46, %v403_v47  ;;  %v1715_v50 = vadd.f32 %v1709_v46, %v458_v48  ;;  %v260_v48 = vld [vmem:[%s1615_s22 + $0x98] sm:$0xff] }
  0xdf   : > { %v1232_v51 = vpop.f32.mrf.mxu0  ;;  %v1265_v52 = vpop.f32.mrf.mxu1 }
  0xe0   : > { %529 = vmax.xlane.f32.xlu1 %v1715_v50  ;;  %507 = vmax.xlane.f32.xlu0 %v1712_v49  ;;  %v261_v51 = vld [vmem:[%s1615_s22 + $0xa0] sm:$0xff]  ;;  %v721_v52 = vpop.permute.xlu1 %720 }
  0xe1   : > { %v408_v53 = vpop.f32.mrf.mxu0  ;;  %v463_v54 = vpop.f32.mrf.mxu1 }
  0xe2   : > { %v1720_v55 = vadd.f32 %v1709_v46, %v408_v53  ;;  %v1724_v60 = vadd.f32 %v1709_v46, %v463_v54 }
  0xe3   : > { %v1235_v56 = vpop.f32.mrf.mxu0  ;;  %v1268_v57 = vpop.f32.mrf.mxu1 }
  0xe4   : > { %509 = vmax.xlane.f32.xlu0 %v1720_v55  ;;  %v727_v53 = vpop.permute.xlu1 %726  ;;  %v717_v56 = vlaneseq }
  0xe5   : > { %v413_v58 = vpop.f32.mrf.mxu0  ;;  %v468_v59 = vpop.f32.mrf.mxu1 }
  0xe6   : > { %v1727_v61 = vadd.f32 %v1709_v46, %v413_v58  ;;  %v1732_v3 = vadd.f32 %v1709_v46, %v468_v59  ;;  %v1798_v57 = vand.u32 127, %v717_v56  ;;  %v724_v59 = vpop.permute.xlu0 %723 }
  0xe7   : > { %v1238_v62 = vpop.f32.mrf.mxu0  ;;  %v1271_v63 = vpop.f32.mrf.mxu1 }
  0xe8   : > { %531 = vmax.xlane.f32.xlu0 %v1724_v60  ;;  %511 = vmax.xlane.f32.xlu1 %v1727_v61  ;;  %v730_v54 = vpop.permute.xlu1 %729  ;;  %vm782_vm2 = vcmp.eq.s32.totalorder %v1798_v57, %v721_v52  ;;  %vm783_vm3 = vcmp.eq.s32.totalorder %v1798_v57, %v724_v59  ;;  %vm784_vm4 = vcmp.eq.s32.totalorder %v1798_v57, %v727_v53 }
  0xe9   : > { %v418_v0 = vpop.f32.mrf.mxu0  ;;  %v473_v2 = vpop.f32.mrf.mxu1  ;;  %v803_v62 = vsel %vm782_vm2, %v1712_v49, 0.0  ;;  %v804_v63 = vsel %vm783_vm3, %v1720_v55, 0.0  ;;  %vm785_vm5 = vcmp.eq.s32.totalorder %v1798_v57, %v730_v54 }
  0xea   : > { %v1735_v4 = vadd.f32 %v1709_v46, %v473_v2  ;;  %v1740_v9 = vadd.f32 %v1709_v46, %v418_v0  ;;  %v805_v0 = vsel %vm784_vm4, %v1727_v61, 0.0 }
  0xeb   : > { %v1241_v5 = vpop.f32.mrf.mxu0  ;;  %v1274_v6 = vpop.f32.mrf.mxu1 }
  0xec   : > { %535 = vmax.xlane.f32.xlu0 %v1735_v4  ;;  %533 = vmax.xlane.f32.xlu1 %v1732_v3  ;;  %v733_v58 = vpop.permute.xlu1 %732  ;;  %v806_v5 = vsel %vm785_vm5, %v1740_v9, 0.0 }
  0xed   : > { %v423_v7 = vpop.f32.mrf.mxu0  ;;  %v478_v8 = vpop.f32.mrf.mxu1  ;;  %vm786_vm6 = vcmp.eq.s32.totalorder %v1798_v57, %v733_v58 }
  0xee   : > { %v1743_v10 = vadd.f32 %v1709_v46, %v423_v7  ;;  %v1748_v15 = vadd.f32 %v1709_v46, %v478_v8 }
  0xef   : > { %v1244_v11 = vpop.f32.mrf.mxu0  ;;  %v1277_v12 = vpop.f32.mrf.mxu1 }
  0xf0   : > { %513 = vmax.xlane.f32.xlu1 %v1740_v9  ;;  %515 = vmax.xlane.f32.xlu0 %v1743_v10  ;;  %v807_v7 = vsel %vm786_vm6, %v1743_v10, 0.0 }
  0xf1   : > { %v428_v13 = vpop.f32.mrf.mxu0  ;;  %v483_v14 = vpop.f32.mrf.mxu1 }
  0xf2   : > { %v1751_v16 = vadd.f32 %v1709_v46, %v483_v14  ;;  %v1756_v21 = vadd.f32 %v1709_v46, %v428_v13  ;;  %v1820_v14 = vpop.permute.xlu0 %750 }
  0xf3   : > { %v1247_v17 = vpop.f32.mrf.mxu0  ;;  %v1280_v18 = vpop.f32.mrf.mxu1  ;;  %vm792_vm12 = vcmp.eq.s32.totalorder %v1798_v57, %v1820_v14 }
  0xf4   : > { %537 = vmax.xlane.f32.xlu1 %v1748_v15  ;;  %539 = vmax.xlane.f32.xlu0 %v1751_v16 }
  0xf5   : > { %v433_v19 = vpop.f32.mrf.mxu0  ;;  %v488_v20 = vpop.f32.mrf.mxu1 }
  0xf6   : > { %v1759_v22 = vadd.f32 %v1709_v46, %v433_v19  ;;  %v1764_v27 = vadd.f32 %v1709_v46, %v488_v20  ;;  %v1824_v18 = vpop.permute.xlu0 %756 }
  0xf7   : > { %v1250_v23 = vpop.f32.mrf.mxu0  ;;  %v1283_v24 = vpop.f32.mrf.mxu1  ;;  %vm794_vm14 = vcmp.eq.s32.totalorder %v1798_v57, %v1824_v18 }
  0xf8   : > { %517 = vmax.xlane.f32.xlu1 %v1756_v21  ;;  %519 = vmax.xlane.f32.xlu0 %v1759_v22 }
  0xf9   : > { %v438_v25 = vpop.f32.mrf.mxu0  ;;  %v493_v26 = vpop.f32.mrf.mxu1 }
  0xfa   : > { %v1767_v28 = vadd.f32 %v1709_v46, %v493_v26  ;;  %v1772_v33 = vadd.f32 %v1709_v46, %v438_v25  ;;  %v1828_v20 = vpop.permute.xlu0 %762 }
  0xfb   : > { %v1253_v29 = vpop.f32.mrf.mxu0  ;;  %v1286_v30 = vpop.f32.mrf.mxu1  ;;  %vm796_vm0 = vcmp.eq.s32.totalorder %v1798_v57, %v1828_v20 }
  0xfc   : > { %541 = vmax.xlane.f32.xlu1 %v1764_v27  ;;  %543 = vmax.xlane.f32.xlu0 %v1767_v28  ;;  %v817_v14 = vsel %vm796_vm0, %v1735_v4, 0.0 }
  0xfd   : > { %v443_v31 = vpop.f32.mrf.mxu0  ;;  %v498_v32 = vpop.f32.mrf.mxu1 }
  0xfe   : > { %v1775_v34 = vadd.f32 %v1709_v46, %v443_v31  ;;  %v1780_v39 = vadd.f32 %v1709_v46, %v498_v32  ;;  %v1832_v24 = vpop.permute.xlu0 %768 }
  0xff   : > { %v1256_v35 = vpop.f32.mrf.mxu0  ;;  %v1289_v36 = vpop.f32.mrf.mxu1  ;;  %vm798_vm2 = vcmp.eq.s32.totalorder %v1798_v57, %v1832_v24 }
 0x100   : > { %521 = vmax.xlane.f32.xlu1 %v1772_v33  ;;  %523 = vmax.xlane.f32.xlu0 %v1775_v34 }
 0x101   : > { %v448_v37 = vpop.f32.mrf.mxu0  ;;  %v503_v38 = vpop.f32.mrf.mxu1 }
 0x102   : > { %v1783_v40 = vadd.f32 %v1709_v46, %v503_v38  ;;  %v1788_v44 = vadd.f32 %v1709_v46, %v448_v37  ;;  %v1836_v26 = vpop.permute.xlu0 %774 }
 0x103   : > { %v1259_v41 = vpop.f32.mrf.mxu0  ;;  %v1292_v42 = vpop.f32.mrf.mxu1  ;;  %vm800_vm4 = vcmp.eq.s32.totalorder %v1798_v57, %v1836_v26 }
 0x104   : > { %545 = vmax.xlane.f32.xlu1 %v1780_v39  ;;  %547 = vmax.xlane.f32.xlu0 %v1783_v40  ;;  %v821_v18 = vsel %vm800_vm4, %v1767_v28, 0.0 }
 0x105   : > { %v453_v43 = vpop.f32.mrf.mxu0 }
 0x106   : > { %v1791_v45 = vadd.f32 %v1709_v46, %v453_v43  ;;  %v736_v46 = vpop.permute.xlu1 %735 }
 0x107   : > { %v1262_v47 = vpop.f32.mrf.mxu0  ;;  %vm787_vm7 = vcmp.eq.s32.totalorder %v1798_v57, %v736_v46 }
 0x108   : > { %525 = vmax.xlane.f32.xlu1 %v1788_v44  ;;  %527 = vmax.xlane.f32.xlu0 %v1791_v45  ;;  %v808_v8 = vsel %vm787_vm7, %v1756_v21, 0.0 }
 0x10a   : > { %v739_v2 = vpop.permute.xlu1 %738 }
 0x10b   : > { %vm788_vm8 = vcmp.eq.s32.totalorder %v1798_v57, %v739_v2 }
 0x10c   : > { %v809_v12 = vsel %vm788_vm8, %v1759_v22, 0.0 }
 0x10e   : > { %v1809_v6 = vpop.permute.xlu1 %741 }
 0x10f   : > { %vm789_vm9 = vcmp.eq.s32.totalorder %v1798_v57, %v1809_v6 }
 0x112   : > { %v1815_v11 = vpop.permute.xlu1 %744 }
 0x113   : > { %vm790_vm10 = vcmp.eq.s32.totalorder %v1798_v57, %v1815_v11  ;;  %v813_v11 = vsel %vm792_vm12, %v1791_v45, 0.0 }
 0x116   : > { %v1818_v13 = vpop.permute.xlu1 %747 }
 0x117   : > { %vm791_vm11 = vcmp.eq.s32.totalorder %v1798_v57, %v1818_v13 }
 0x119   : > { %777 = vperm.xlu1 %1347, %v260_v48  }
 0x11a   : > { %v1822_v17 = vpop.permute.xlu1 %753 }
 0x11b   : > { %vm793_vm13 = vcmp.eq.s32.totalorder %v1798_v57, %v1822_v17  ;;  %v819_v17 = vsel %vm798_vm2, %v1751_v16, 0.0 }
 0x11c   : > { %v814_v13 = vsel %vm793_vm13, %v1715_v50, 0.0 }
 0x11e   : > { %780 = vperm.xlu0 %1348, %v261_v51   ;;  %v1826_v19 = vpop.permute.xlu1 %759 }
 0x11f   : > { %vm795_vm15 = vcmp.eq.s32.totalorder %v1798_v57, %v1826_v19 }
 0x122   : > { %v1830_v23 = vpop.permute.xlu1 %765 }
 0x123   : > { %vm797_vm1 = vcmp.eq.s32.totalorder %v1798_v57, %v1830_v23 }
 0x126   : > { %v1834_v25 = vpop.permute.xlu1 %771 }
 0x127   : > { %vm799_vm3 = vcmp.eq.s32.totalorder %v1798_v57, %v1834_v25 }
 0x13d   : > { %824 = vadd.xlane.f32.xlu1 %v803_v62  ;;  %826 = vadd.xlane.f32.xlu0 %v804_v63 }
 0x141   : > { %828 = vadd.xlane.f32.xlu0 %v805_v0 }
 0x145   : > { %830 = vadd.xlane.f32.xlu0 %v806_v5 }
 0x149   : > { %832 = vadd.xlane.f32.xlu0 %v807_v7 }
 0x14d   : > { %834 = vadd.xlane.f32.xlu0 %v808_v8 }
 0x151   : > { %836 = vadd.xlane.f32.xlu0 %v809_v12 }
 0x169   : > { %v1838_v29 = vpop.xlane.xlu1 %529  ;;  %v1840_v30 = vpop.xlane.xlu0 %507 }
 0x16a   : > { %v549_v31 = vsub.f32 %v1712_v49, %v1840_v30  ;;  %v560_v32 = vsub.f32 %v1715_v50, %v1838_v29  ;;  %v818_v50 = vsel %vm797_vm1, %v1748_v15, 0.0 }
 0x16c   : > { %v570_v35 = vmul.f32 1.442695, %v549_v31  ;;  %v592_v38 = vmul.f32 1.442695, %v560_v32 }
 0x16d   : > { %v1846_v36 = vpop.xlane.xlu0 %509 }
 0x16e   : > { %v550_v37 = vsub.f32 %v1720_v55, %v1846_v36  ;;  %1349 = vpow2.f32 %v570_v35 }
 0x170   : > { %v572_v41 = vmul.f32 1.442695, %v550_v37 }
 0x171   : > { %v1850_v42 = vpop.xlane.xlu0 %531  ;;  %v1852_v43 = vpop.xlane.xlu1 %511 }
 0x172   : > { %1351 = vpow2.f32 %v572_v41  ;;  %v561_v49 = vsub.f32 %v1724_v60, %v1850_v42  ;;  %v551_v47 = vsub.f32 %v1727_v61, %v1852_v43 }
 0x173   : > { %1353 = vpow2.f32 %v592_v38 }
 0x174   : > { %v594_v48 = vmul.f32 1.442695, %v561_v49  ;;  %v574_v51 = vmul.f32 1.442695, %v551_v47 }
 0x175   : > { %v1858_v52 = vpop.xlane.xlu0 %535  ;;  %v1860_v55 = vpop.xlane.xlu1 %533 }
 0x176   : > { %1355 = vpow2.f32 %v594_v48  ;;  %v562_v53 = vsub.f32 %v1732_v3, %v1860_v55  ;;  %v563_v62 = vsub.f32 %v1735_v4, %v1858_v52 }
 0x177   : > { %1357 = vpow2.f32 %v574_v51 }
 0x178   : > { %v596_v54 = vmul.f32 1.442695, %v562_v53  ;;  %v598_v12 = vmul.f32 1.442695, %v563_v62 }
 0x179   : > { %v1864_v58 = vpop.xlane.xlu1 %513  ;;  %v1866_v59 = vpop.xlane.xlu0 %515 }
 0x17a   : > { %v552_v61 = vsub.f32 %v1740_v9, %v1864_v58  ;;  %v553_v46 = vsub.f32 %v1743_v10, %v1866_v59  ;;  %1359 = vpow2.f32 %v596_v54 }
 0x17b   : > { %v1350_v63 = vpop.eup %1349 }
 0x17c   : > { %v576_v0 = vmul.f32 1.442695, %v552_v61  ;;  %v578_v2 = vmul.f32 1.442695, %v553_v46  ;;  %612 = vadd.xlane.f32.xlu1 %v1350_v63 }
 0x17d   : > { %v1874_v5 = vpop.xlane.xlu1 %537  ;;  %v1876_v7 = vpop.xlane.xlu0 %539 }
 0x17e   : > { %1361 = vpow2.f32 %v576_v0  ;;  %v564_v8 = vsub.f32 %v1748_v15, %v1874_v5 }
 0x17f   : > { %v1352_v9 = vpop.eup %1351  ;;  %1363 = vpow2.f32 %v578_v2 }
 0x180   : > { %v1354_v10 = vpop.eup %1353  ;;  %614 = vadd.xlane.f32.xlu0 %v1352_v9  ;;  %v600_v35 = vmul.f32 1.442695, %v564_v8  ;;  %1365 = vpow2.f32 %v598_v12 }
 0x181   : > { %634 = vadd.xlane.f32.xlu1 %v1354_v10  ;;  %v1880_v31 = vpop.xlane.xlu1 %517  ;;  %v1882_v32 = vpop.xlane.xlu0 %519 }
 0x182   : > { %v555_v37 = vsub.f32 %v1759_v22, %v1882_v32  ;;  %v554_v41 = vsub.f32 %v1756_v21, %v1880_v31  ;;  %1367 = vpow2.f32 %v600_v35 }
 0x183   : > { %v1356_v38 = vpop.eup %1355 }
 0x184   : > { %v1358_v49 = vpop.eup %1357  ;;  %v582_v47 = vmul.f32 1.442695, %v555_v37  ;;  %v580_v53 = vmul.f32 1.442695, %v554_v41  ;;  %v565_v37 = vsub.f32 %v1751_v16, %v1876_v7 }
 0x185   : > { %636 = vadd.xlane.f32.xlu1 %v1356_v38  ;;  %616 = vadd.xlane.f32.xlu0 %v1358_v49  ;;  %v1888_v48 = vpop.xlane.xlu1 %541  ;;  %v1890_v51 = vpop.xlane.xlu0 %543 }
 0x186   : > { %1369 = vpow2.f32 %v582_v47 }
 0x187   : > { %v1360_v54 = vpop.eup %1359  ;;  %1371 = vpow2.f32 %v580_v53 }
 0x189   : > { %638 = vadd.xlane.f32.xlu1 %v1360_v54  ;;  %v1892_v61 = vpop.xlane.xlu1 %521  ;;  %v1894_v22 = vpop.xlane.xlu0 %523 }
 0x18a   : > { %v556_v21 = vsub.f32 %v1772_v33, %v1892_v61  ;;  %v557_v46 = vsub.f32 %v1775_v34, %v1894_v22 }
 0x18b   : > { %v1362_v62 = vpop.eup %1361 }
 0x18c   : > { %v1364_v63 = vpop.eup %1363  ;;  %v584_v0 = vmul.f32 1.442695, %v556_v21  ;;  %v586_v2 = vmul.f32 1.442695, %v557_v46  ;;  %v602_v21 = vmul.f32 1.442695, %v565_v37  ;;  %v566_v46 = vsub.f32 %v1764_v27, %v1888_v48 }
 0x18d   : > { %618 = vadd.xlane.f32.xlu1 %v1362_v62  ;;  %620 = vadd.xlane.f32.xlu0 %v1364_v63  ;;  %v1900_v8 = vpop.xlane.xlu1 %545  ;;  %v1902_v9 = vpop.xlane.xlu0 %547 }
 0x18e   : > { %1373 = vpow2.f32 %v584_v0  ;;  %v1366_v12 = vpop.eup %1365  ;;  %v604_v63 = vmul.f32 1.442695, %v566_v46  ;;  %v567_v0 = vsub.f32 %v1767_v28, %v1890_v51  ;;  %v568_v37 = vsub.f32 %v1780_v39, %v1900_v8 }
 0x18f   : > { %1375 = vpow2.f32 %v586_v2  ;;  %v1368_v49 = vpop.eup %1367  ;;  %v810_v46 = vsel %vm789_vm9, %v1772_v33, 0.0  ;;  %vm950_vm9 = vcmask 7168  }
 0x191   : > { %640 = vadd.xlane.f32.xlu1 %v1366_v12  ;;  %v1904_v10 = vpop.xlane.xlu1 %525  ;;  %v1906_v35 = vpop.xlane.xlu0 %527 }
 0x192   : > { %v558_v38 = vsub.f32 %v1788_v44, %v1904_v10  ;;  %v559_v41 = vsub.f32 %v1791_v45, %v1906_v35  ;;  %v816_v45 = vsel %vm795_vm15, %v1732_v3, 0.0  ;;  %v820_v3 = vsel %vm799_vm3, %v1764_v27, 0.0 }
 0x193   : > { %v1370_v47 = vpop.eup %1369 }
 0x194   : > { %v588_v53 = vmul.f32 1.442695, %v558_v38  ;;  %v590_v54 = vmul.f32 1.442695, %v559_v41  ;;  %624 = vadd.xlane.f32.xlu0 %v1370_v47  ;;  %v1372_v62 = vpop.eup %1371  ;;  %v606_v38 = vmul.f32 1.442695, %v567_v0 }
 0x195   : > { %642 = vadd.xlane.f32.xlu1 %v1368_v49  ;;  %v608_v41 = vmul.f32 1.442695, %v568_v37  ;;  %v569_v49 = vsub.f32 %v1783_v40, %v1902_v9  ;;  %v812_v0 = vsel %vm791_vm11, %v1788_v44, 0.0  ;;  %v815_v44 = vsel %vm794_vm14, %v1724_v60, 0.0  ;;  %v778_v60 = vpop.permute.xlu1 %777 }
 0x196   : > { %1377 = vpow2.f32 %v588_v53  ;;  %vm801_vm5 = vcmp.eq.s32.totalorder %v1798_v57, %v778_v60 }
 0x197   : > { %1379 = vpow2.f32 %v590_v54  ;;  %v610_v54 = vmul.f32 1.442695, %v569_v49  ;;  %v822_v15 = vsel %vm801_vm5, %v1780_v39, 0.0 }
 0x198   : > { %1381 = vpow2.f32 %v602_v21 }
 0x199   : > { %622 = vadd.xlane.f32.xlu1 %v1372_v62  ;;  %1383 = vpow2.f32 %v604_v63  ;;  %v811_v63 = vsel %vm790_vm10, %v1775_v34, 0.0  ;;  %v781_v4 = vpop.permute.xlu0 %780 }
 0x19a   : > { %1385 = vpow2.f32 %v606_v38  ;;  %vm802_vm6 = vcmp.eq.s32.totalorder %v1798_v57, %v781_v4 }
 0x19b   : > { %v1374_v2 = vpop.eup %1373  ;;  %1387 = vpow2.f32 %v608_v41  ;;  %v823_v16 = vsel %vm802_vm6, %v1783_v40, 0.0 }
 0x19c   : > { %v1376_v12 = vpop.eup %1375  ;;  %1389 = vpow2.f32 %v610_v54 }
 0x19d   : > { %626 = vadd.xlane.f32.xlu1 %v1374_v2  ;;  %628 = vadd.xlane.f32.xlu0 %v1376_v12 }
 0x1a3   : > { %v1378_v47 = vpop.eup %1377 }
 0x1a4   : > { %v1380_v53 = vpop.eup %1379  ;;  %630 = vadd.xlane.f32.xlu1 %v1378_v47 }
 0x1a5   : > { %632 = vadd.xlane.f32.xlu0 %v1380_v53  ;;  %v1382_v21 = vpop.eup %1381 }
 0x1a6   : > { %v1384_v62 = vpop.eup %1383 }
 0x1a7   : > { %v1386_v6 = vpop.eup %1385 }
 0x1a8   : > { %644 = vadd.xlane.f32.xlu1 %v1382_v21  ;;  %v1388_v33 = vpop.eup %1387 }
 0x1a9   : > { %838 = vadd.xlane.f32.xlu0 %v810_v46  ;;  %v1390_v34 = vpop.eup %1389 }
 0x1ac   : > { %646 = vadd.xlane.f32.xlu1 %v1384_v62 }
 0x1ad   : > { %840 = vadd.xlane.f32.xlu0 %v811_v63 }
 0x1b0   : > { %648 = vadd.xlane.f32.xlu1 %v1386_v6 }
 0x1b1   : > { %842 = vadd.xlane.f32.xlu0 %v812_v0 }
 0x1b4   : > { %650 = vadd.xlane.f32.xlu1 %v1388_v33 }
 0x1b5   : > { %844 = vadd.xlane.f32.xlu0 %v813_v11 }
 0x1b8   : > { %652 = vadd.xlane.f32.xlu1 %v1390_v34 }
 0x1b9   : > { %846 = vadd.xlane.f32.xlu0 %v814_v13 }
 0x1bc   : > { %848 = vadd.xlane.f32.xlu1 %v815_v44 }
 0x1bd   : > { %850 = vadd.xlane.f32.xlu0 %v816_v45 }
 0x1c0   : > { %852 = vadd.xlane.f32.xlu1 %v817_v14 }
 0x1c1   : > { %854 = vadd.xlane.f32.xlu0 %v818_v50 }
 0x1c4   : > { %856 = vadd.xlane.f32.xlu1 %v819_v17 }
 0x1c5   : > { %858 = vadd.xlane.f32.xlu0 %v820_v3 }
 0x1c6   : > { %v827_v19 = vpop.xlane.xlu0 %826  ;;  %v1970_v25 = vpop.xlane.xlu1 %824 }
 0x1c7   : > { %vm887_vm7 = vcmp.ge.f32.partialorder %v1970_v25, %v1840_v30  ;;  %vm888_vm8 = vcmp.ge.f32.partialorder %v827_v19, %v1846_v36 }
 0x1c8   : > { %860 = vadd.xlane.f32.xlu1 %v821_v18  ;;  %v1172_v11 = vsel %vm887_vm7, 1.0, %v1495_v1  ;;  %v1173_v13 = vsel %vm888_vm8, 1.0, %v1495_v1 }
 0x1c9   : > { %862 = vadd.xlane.f32.xlu0 %v822_v15  ;;  %v1001_v3 = vsel %vm950_vm9, %v1172_v11, 0.0  ;;  %v1002_v4 = vsel %vm950_vm9, %v1173_v13, 0.0 }
 0x1ca   : > { %v1962_v20 = vpop.xlane.xlu0 %828 }
 0x1cb   : > { %vm889_vm10 = vcmp.ge.f32.partialorder %v1962_v20, %v1852_v43 }
 0x1cc   : > { %864 = vadd.xlane.f32.xlu1 %v823_v16  ;;  %v1003_v16 = vadd.f32 %v1002_v4, %v1001_v3 }
 0x1ce   : > { %v1964_v23 = vpop.xlane.xlu0 %830 }
 0x1cf   : > { %vm890_vm11 = vcmp.ge.f32.partialorder %v1964_v23, %v1864_v58 }
 0x1d2   : > { %v1966_v27 = vpop.xlane.xlu0 %832 }
 0x1d3   : > { %vm891_vm12 = vcmp.ge.f32.partialorder %v1966_v27, %v1866_v59 }
 0x1d6   : > { %v1968_v24 = vpop.xlane.xlu0 %834 }
 0x1d7   : > { %vm892_vm13 = vcmp.ge.f32.partialorder %v1968_v24, %v1880_v31 }
 0x1da   : > { %v1972_v28 = vpop.xlane.xlu0 %836 }
 0x1db   : > { %vm893_vm14 = vcmp.ge.f32.partialorder %v1972_v28, %v1882_v32 }
 0x1dc   : > { %v1178_v13 = vsel %vm893_vm14, 1.0, %v1495_v1 }
 0x1dd   : > { %v1012_v4 = vsel %vm950_vm9, %v1178_v13, 0.0 }
 0x205   : > { %v613_v57 = vpop.xlane.xlu1 %612 }
 0x209   : > { %v615_v26 = vpop.xlane.xlu0 %614 }
 0x20a   : > { %v635_v39 = vpop.xlane.xlu1 %634  ;;  %1391 = vlog2.f32 %v615_v26 }
 0x20b   : > { %1393 = vlog2.f32 %v613_v57 }
 0x20e   : > { %v637_v2 = vpop.xlane.xlu1 %636  ;;  %v617_v12 = vpop.xlane.xlu0 %616 }
 0x20f   : > { %1395 = vlog2.f32 %v617_v12 }
 0x212   : > { %v639_v40 = vpop.xlane.xlu1 %638 }
 0x216   : > { %v619_v38 = vpop.xlane.xlu1 %618  ;;  %v621_v37 = vpop.xlane.xlu0 %620 }
 0x217   : > { %1397 = vlog2.f32 %v619_v38  ;;  %v1392_v49 = vpop.eup %1391 }
 0x218   : > { %1399 = vlog2.f32 %v621_v37  ;;  %v1394_v47 = vpop.eup %1393  ;;  %v657_v46 = vmul.f32 0.6931472, %v1392_v49 }
 0x219   : > { %v655_v62 = vmul.f32 0.6931472, %v1394_v47 }
 0x21a   : > { %v641_v41 = vpop.xlane.xlu1 %640  ;;  %v697_v0 = vadd.f32 %v657_v46, %v1846_v36 }
 0x21b   : > { %v696_v44 = vadd.f32 %v655_v62, %v1840_v30  ;;  %v1174_v30 = vsel %vm889_vm10, 1.0, %v1495_v1  ;;  %v1177_v62 = vsel %vm892_vm13, 1.0, %v1495_v1 }
 0x21c   : > { %v1396_v53 = vpop.eup %1395  ;;  %v867_v36 = vsub.f32 %v697_v0, %v827_v19  ;;  %v1004_v26 = vsel %vm950_vm9, %v1174_v30, 0.0 }
 0x21d   : > { %v625_v21 = vpop.xlane.xlu0 %624  ;;  %v659_v63 = vmul.f32 0.6931472, %v1396_v53  ;;  %v1005_v49 = vadd.f32 %v1004_v26, %v1003_v16 }
 0x21e   : > { %v643_v54 = vpop.xlane.xlu1 %642  ;;  %1401 = vlog2.f32 %v625_v21  ;;  %v952_v19 = vsel %vm950_vm9, %v867_v36, 0.0 }
 0x21f   : > { %v698_v45 = vadd.f32 %v659_v63, %v1852_v43  ;;  %v866_v43 = vsub.f32 %v696_v44, %v1970_v25 }
 0x221   : > { %v868_v15 = vsub.f32 %v698_v45, %v1962_v20  ;;  %v1176_v20 = vsel %vm891_vm12, 1.0, %v1495_v1  ;;  %v951_v12 = vsel %vm950_vm9, %v866_v43, 0.0 }
 0x222   : > { %v623_v6 = vpop.xlane.xlu1 %622  ;;  %v1008_v46 = vsel %vm950_vm9, %v1176_v20, 0.0 }
 0x223   : > { %1403 = vlog2.f32 %v623_v6 }
 0x224   : > { %v1398_v33 = vpop.eup %1397  ;;  %1405 = vlog2.f32 %v635_v39  ;;  %v1175_v39 = vsel %vm890_vm11, 1.0, %v1495_v1 }
 0x225   : > { %v1400_v34 = vpop.eup %1399  ;;  %v661_v14 = vmul.f32 0.6931472, %v1398_v33 }
 0x226   : > { %v627_v50 = vpop.xlane.xlu1 %626  ;;  %v629_v60 = vpop.xlane.xlu0 %628  ;;  %v663_v18 = vmul.f32 0.6931472, %v1400_v34 }
 0x227   : > { %v699_v17 = vadd.f32 %v661_v14, %v1864_v58  ;;  %1407 = vlog2.f32 %v627_v50 }
 0x228   : > { %1409 = vlog2.f32 %v629_v60  ;;  %v700_v58 = vadd.f32 %v663_v18, %v1866_v59  ;;  %v1006_v59 = vsel %vm950_vm9, %v1175_v39, 0.0 }
 0x229   : > { %1411 = vlog2.f32 %v637_v2  ;;  %v869_v57 = vsub.f32 %v699_v17, %v1964_v23  ;;  %v954_v2 = vsel %vm950_vm9, %v868_v15, 0.0  ;;  %v953_v23 = vadd.f32 %v952_v19, %v951_v12 }
 0x22a   : > { %1413 = vlog2.f32 %v639_v40  ;;  %v1007_v0 = vadd.f32 %v1006_v59, %v1005_v49 }
 0x22b   : > { %1415 = vlog2.f32 %v641_v41  ;;  %v1402_v25 = vpop.eup %1401  ;;  %v956_v41 = vsel %vm950_vm9, %v869_v57, 0.0  ;;  %v955_v53 = vadd.f32 %v954_v2, %v953_v23 }
 0x22c   : > { %1417 = vlog2.f32 %v643_v54  ;;  %v667_v40 = vmul.f32 0.6931472, %v1402_v25  ;;  %v870_v54 = vsub.f32 %v700_v58, %v1966_v27  ;;  %v1009_v14 = vadd.f32 %v1008_v46, %v1007_v0 }
 0x22d   : > { %v631_v38 = vpop.xlane.xlu1 %630  ;;  %v957_v33 = vadd.f32 %v956_v41, %v955_v53  ;;  %v1010_v27 = vsel %vm950_vm9, %v1177_v62, 0.0 }
 0x22e   : > { %1419 = vlog2.f32 %v631_v38  ;;  %v633_v37 = vpop.xlane.xlu0 %632  ;;  %v702_v21 = vadd.f32 %v667_v40, %v1882_v32  ;;  %v958_v32 = vsel %vm950_vm9, %v870_v54, 0.0  ;;  %v1011_v19 = vadd.f32 %v1010_v27, %v1009_v14 }
 0x22f   : > { %1421 = vlog2.f32 %v633_v37 }
 0x230   : > { %v1404_v47 = vpop.eup %1403  ;;  %v872_v50 = vsub.f32 %v702_v21, %v1972_v28  ;;  %v1013_v38 = vadd.f32 %v1012_v4, %v1011_v19 }
 0x231   : > { %v665_v63 = vmul.f32 0.6931472, %v1404_v47  ;;  %v645_v6 = vpop.xlane.xlu1 %644  ;;  %v1406_v34 = vpop.eup %1405 }
 0x232   : > { %v839_v11 = vpop.xlane.xlu0 %838  ;;  %1423 = vlog2.f32 %v645_v6  ;;  %v677_v15 = vmul.f32 0.6931472, %v1406_v34  ;;  %v962_v25 = vsel %vm950_vm9, %v872_v50, 0.0 }
 0x233   : > { %v701_v44 = vadd.f32 %v665_v63, %v1880_v31  ;;  %vm894_vm15 = vcmp.ge.f32.partialorder %v839_v11, %v1892_v61  ;;  %v959_v31 = vadd.f32 %v958_v32, %v957_v33 }
 0x234   : > { %v1408_v45 = vpop.eup %1407  ;;  %v1179_v26 = vsel %vm894_vm15, 1.0, %v1495_v1 }
 0x235   : > { %v1410_v60 = vpop.eup %1409  ;;  %v871_v36 = vsub.f32 %v701_v44, %v1968_v24  ;;  %v669_v17 = vmul.f32 0.6931472, %v1408_v45  ;;  %v647_v3 = vpop.xlane.xlu1 %646  ;;  %v1014_v59 = vsel %vm950_vm9, %v1179_v26, 0.0 }
 0x236   : > { %v671_v18 = vmul.f32 0.6931472, %v1410_v60  ;;  %1425 = vlog2.f32 %v647_v3  ;;  %v841_v30 = vpop.xlane.xlu0 %840  ;;  %v1412_v43 = vpop.eup %1411 }
 0x237   : > { %v703_v16 = vadd.f32 %v669_v17, %v1892_v61  ;;  %v960_v28 = vsel %vm950_vm9, %v871_v36, 0.0  ;;  %vm895_vm0 = vcmp.ge.f32.partialorder %v841_v30, %v1894_v22  ;;  %v1414_v24 = vpop.eup %1413  ;;  %v679_v47 = vmul.f32 0.6931472, %v1412_v43 }
 0x238   : > { %v961_v57 = vadd.f32 %v960_v28, %v959_v31  ;;  %v704_v39 = vadd.f32 %v671_v18, %v1894_v22  ;;  %v1416_v58 = vpop.eup %1415  ;;  %v1180_v61 = vsel %vm895_vm0, 1.0, %v1495_v1  ;;  %v707_v22 = vadd.f32 %v677_v15, %v1838_v29 }
 0x239   : > { %v873_v20 = vsub.f32 %v703_v16, %v839_v11  ;;  %v649_v12 = vpop.xlane.xlu1 %648  ;;  %v1418_v2 = vpop.eup %1417  ;;  %v681_v46 = vmul.f32 0.6931472, %v1414_v24  ;;  %v1016_v6 = vsel %vm950_vm9, %v1180_v61, 0.0  ;;  %v683_v33 = vmul.f32 0.6931472, %v1416_v58 }
 0x23a   : > { %v963_v23 = vadd.f32 %v962_v25, %v961_v57  ;;  %1427 = vlog2.f32 %v649_v12  ;;  %v843_v40 = vpop.xlane.xlu0 %842  ;;  %v874_v54 = vsub.f32 %v704_v39, %v841_v30  ;;  %v1015_v11 = vadd.f32 %v1014_v59, %v1013_v38 }
 0x23b   : > { %v1420_v37 = vpop.eup %1419  ;;  %v964_v49 = vsel %vm950_vm9, %v873_v20, 0.0  ;;  %vm896_vm1 = vcmp.ge.f32.partialorder %v843_v40, %v1904_v10  ;;  %v685_v44 = vmul.f32 0.6931472, %v1418_v2  ;;  %v708_v4 = vadd.f32 %v679_v47, %v1850_v42 }
 0x23c   : > { %v1422_v41 = vpop.eup %1421  ;;  %v673_v53 = vmul.f32 0.6931472, %v1420_v37  ;;  %v1181_v21 = vsel %vm896_vm1, 1.0, %v1495_v1  ;;  %v965_v63 = vadd.f32 %v964_v49, %v963_v23  ;;  %v966_v27 = vsel %vm950_vm9, %v874_v54, 0.0 }
 0x23d   : > { %v675_v62 = vmul.f32 0.6931472, %v1422_v41  ;;  %v651_v0 = vpop.xlane.xlu1 %650  ;;  %v1018_v45 = vsel %vm950_vm9, %v1181_v21, 0.0  ;;  %v1017_v32 = vadd.f32 %v1016_v6, %v1015_v11  ;;  %v710_v24 = vadd.f32 %v683_v33, %v1858_v52 }
 0x23e   : > { %v705_v34 = vadd.f32 %v673_v53, %v1904_v10  ;;  %1429 = vlog2.f32 %v651_v0  ;;  %v845_v13 = vpop.xlane.xlu0 %844  ;;  %v967_v36 = vadd.f32 %v966_v27, %v965_v63  ;;  %v711_v39 = vadd.f32 %v685_v44, %v1874_v5 }
 0x23f   : > { %v706_v14 = vadd.f32 %v675_v62, %v1906_v35  ;;  %vm897_vm2 = vcmp.ge.f32.partialorder %v845_v13, %v1906_v35  ;;  %v1424_v18 = vpop.eup %1423  ;;  %v1019_v30 = vadd.f32 %v1018_v45, %v1017_v32  ;;  %v709_v35 = vadd.f32 %v681_v46, %v1860_v55 }
 0x240   : > { %v875_v50 = vsub.f32 %v705_v34, %v843_v40  ;;  %v1182_v60 = vsel %vm897_vm2, 1.0, %v1495_v1  ;;  %v687_v58 = vmul.f32 0.6931472, %v1424_v18 }
 0x241   : > { %v876_v17 = vsub.f32 %v706_v14, %v845_v13  ;;  %v1020_v3 = vsel %vm950_vm9, %v1182_v60, 0.0  ;;  %v653_v10 = vpop.xlane.xlu1 %652 }
 0x242   : > { %v968_v31 = vsel %vm950_vm9, %v875_v50, 0.0  ;;  %1431 = vlog2.f32 %v653_v10  ;;  %v847_v43 = vpop.xlane.xlu0 %846  ;;  %v1021_v57 = vadd.f32 %v1020_v3, %v1019_v30 }
 0x243   : > { %v1426_v15 = vpop.eup %1425  ;;  %v969_v16 = vadd.f32 %v968_v31, %v967_v36  ;;  %v877_v28 = vsub.f32 %v707_v22, %v847_v43  ;;  %vm898_vm3 = vcmp.ge.f32.partialorder %v847_v43, %v1838_v29  ;;  %v970_v19 = vsel %vm950_vm9, %v876_v17, 0.0 }
 0x244   : > { %v1183_v26 = vsel %vm898_vm3, 1.0, %v1495_v1  ;;  %v689_v25 = vmul.f32 0.6931472, %v1426_v15 }
 0x245   : > { %v971_v20 = vadd.f32 %v970_v19, %v969_v16  ;;  %v1022_v12 = vsel %vm950_vm9, %v1183_v26, 0.0  ;;  %v849_v2 = vpop.xlane.xlu1 %848  ;;  %v972_v38 = vsel %vm950_vm9, %v877_v28, 0.0 }
 0x246   : > { %v1023_v23 = vadd.f32 %v1022_v12, %v1021_v57  ;;  %v878_v61 = vsub.f32 %v708_v4, %v849_v2  ;;  %vm899_vm4 = vcmp.ge.f32.partialorder %v849_v2, %v1850_v42  ;;  %v851_v29 = vpop.xlane.xlu0 %850  ;;  %v712_v42 = vadd.f32 %v687_v58, %v1876_v7 }
 0x247   : > { %v1428_v40 = vpop.eup %1427  ;;  %v973_v37 = vadd.f32 %v972_v38, %v971_v20  ;;  %v1184_v49 = vsel %vm899_vm4, 1.0, %v1495_v1  ;;  %v879_v59 = vsub.f32 %v709_v35, %v851_v29  ;;  %vm900_vm5 = vcmp.ge.f32.partialorder %v851_v29, %v1860_v55 }
 0x248   : > { %v691_v22 = vmul.f32 0.6931472, %v1428_v40  ;;  %v974_v41 = vsel %vm950_vm9, %v878_v61, 0.0  ;;  %v1024_v47 = vsel %vm950_vm9, %v1184_v49, 0.0  ;;  %v1185_v53 = vsel %vm900_vm5, 1.0, %v1495_v1 }
 0x249   : > { %v975_v54 = vadd.f32 %v974_v41, %v973_v37  ;;  %v1025_v21 = vadd.f32 %v1024_v47, %v1023_v23  ;;  %v853_v46 = vpop.xlane.xlu1 %852  ;;  %v713_v62 = vadd.f32 %v689_v25, %v1888_v48  ;;  %v976_v63 = vsel %vm950_vm9, %v879_v59, 0.0 }
 0x24a   : > { %v1026_v6 = vsel %vm950_vm9, %v1185_v53, 0.0  ;;  %v880_v0 = vsub.f32 %v710_v24, %v853_v46  ;;  %vm901_vm6 = vcmp.ge.f32.partialorder %v853_v46, %v1858_v52  ;;  %v855_v55 = vpop.xlane.xlu0 %854  ;;  %v714_v27 = vadd.f32 %v691_v22, %v1890_v51 }
 0x24b   : > { %v1430_v33 = vpop.eup %1429  ;;  %v977_v11 = vadd.f32 %v976_v63, %v975_v54  ;;  %v1027_v34 = vadd.f32 %v1026_v6, %v1025_v21  ;;  %v1186_v13 = vsel %vm901_vm6, 1.0, %v1495_v1  ;;  %v881_v44 = vsub.f32 %v711_v39, %v855_v55 }
 0x24c   : > { %v978_v45 = vsel %vm950_vm9, %v880_v0, 0.0  ;;  %v1028_v14 = vsel %vm950_vm9, %v1186_v13, 0.0  ;;  %vm902_vm7 = vcmp.ge.f32.partialorder %v855_v55, %v1874_v5  ;;  %v693_v32 = vmul.f32 0.6931472, %v1430_v33 }
 0x24d   : > { %v979_v50 = vadd.f32 %v978_v45, %v977_v11  ;;  %v1029_v60 = vadd.f32 %v1028_v14, %v1027_v34  ;;  %v1187_v52 = vsel %vm902_vm7, 1.0, %v1495_v1  ;;  %v857_v36 = vpop.xlane.xlu1 %856  ;;  %v980_v17 = vsel %vm950_vm9, %v881_v44, 0.0 }
 0x24e   : > { %v1030_v3 = vsel %vm950_vm9, %v1187_v52, 0.0  ;;  %v882_v10 = vsub.f32 %v712_v42, %v857_v36  ;;  %vm903_vm8 = vcmp.ge.f32.partialorder %v857_v36, %v1876_v7  ;;  %v859_v4 = vpop.xlane.xlu0 %858  ;;  %v715_v7 = vadd.f32 %v693_v32, %v1900_v8 }
 0x24f   : > { %v1432_v18 = vpop.eup %1431  ;;  %v981_v31 = vadd.f32 %v980_v17, %v979_v50  ;;  %v1031_v30 = vadd.f32 %v1030_v3, %v1029_v60  ;;  %v1188_v5 = vsel %vm903_vm8, 1.0, %v1495_v1  ;;  %v883_v43 = vsub.f32 %v713_v62, %v859_v4 }
 0x250   : > { %v695_v35 = vmul.f32 0.6931472, %v1432_v18  ;;  %v982_v15 = vsel %vm950_vm9, %v882_v10, 0.0  ;;  %v1032_v16 = vsel %vm950_vm9, %v1188_v5, 0.0  ;;  %vm904_vm10 = vcmp.ge.f32.partialorder %v859_v4, %v1888_v48 }
 0x251   : > { %v983_v28 = vadd.f32 %v982_v15, %v981_v31  ;;  %v1033_v24 = vadd.f32 %v1032_v16, %v1031_v30  ;;  %v1189_v19 = vsel %vm904_vm10, 1.0, %v1495_v1  ;;  %v861_v57 = vpop.xlane.xlu1 %860  ;;  %v984_v26 = vsel %vm950_vm9, %v883_v43, 0.0 }
 0x252   : > { %v1034_v39 = vsel %vm950_vm9, %v1189_v19, 0.0  ;;  %v884_v58 = vsub.f32 %v714_v27, %v861_v57  ;;  %vm905_vm11 = vcmp.ge.f32.partialorder %v861_v57, %v1890_v51  ;;  %v863_v25 = vpop.xlane.xlu0 %862  ;;  %v716_v61 = vadd.f32 %v695_v35, %v1902_v9 }
 0x253   : > { %v985_v20 = vadd.f32 %v984_v26, %v983_v28  ;;  %v1035_v12 = vadd.f32 %v1034_v39, %v1033_v24  ;;  %v1190_v2 = vsel %vm905_vm11, 1.0, %v1495_v1  ;;  %v885_v48 = vsub.f32 %v715_v7, %v863_v25 }
 0x254   : > { %v986_v38 = vsel %vm950_vm9, %v884_v58, 0.0  ;;  %v1036_v23 = vsel %vm950_vm9, %v1190_v2, 0.0  ;;  %vm906_vm12 = vcmp.ge.f32.partialorder %v863_v25, %v1900_v8  ;;  %v1052_v14 = vshrl.u32 %v717_v56, 7 }
 0x255   : > { %v987_v29 = vadd.f32 %v986_v38, %v985_v20  ;;  %v1037_v40 = vadd.f32 %v1036_v23, %v1035_v12  ;;  %v1191_v37 = vsel %vm906_vm12, 1.0, %v1495_v1  ;;  %v865_v49 = vpop.xlane.xlu1 %864  ;;  %v988_v51 = vsel %vm950_vm9, %v885_v48, 0.0 }
 0x256   : > { %v1038_v59 = vsel %vm950_vm9, %v1191_v37, 0.0  ;;  %v886_v22 = vsub.f32 %v716_v61, %v865_v49  ;;  %vm907_vm13 = vcmp.ge.f32.partialorder %v865_v49, %v1902_v9 }
 0x257   : > { %v1192_v41 = vsel %vm907_vm13, 1.0, %v1495_v1  ;;  %v1039_v47 = vadd.f32 %v1038_v59, %v1037_v40  ;;  %v989_v53 = vadd.f32 %v988_v51, %v987_v29 }
 0x258   : > { %v1040_v8 = vsel %vm950_vm9, %v1192_v41, 0.0  ;;  %v990_v54 = vsel %vm950_vm9, %v886_v22, 0.0  ;;  %vm1053_vm9 = vcmp.lt.s32.totalorder %v1052_v14, 4 }
 0x259   : > { %v1041_v21 = vadd.f32 %v1040_v8, %v1039_v47  ;;  %v991_v46 = vadd.f32 %v990_v54, %v989_v53 }
 0x25b   : > { %1042 = vadd.xlane.f32.xlu1 %v1041_v21  ;;  %992 = vadd.xlane.f32.xlu0 %v991_v46 }
 0x2e4   : > { %v1043_v42 = vpop.xlane.xlu1 %1042  ;;  %v993_v62 = vpop.xlane.xlu0 %992 }
 0x2e5   : > { %v1044_v63 = vrot.slane %v1043_v42, 4  ;;  %v994_v6 = vrot.slane %v993_v62, 4 }
 0x2e7   : > { %v1045_v0 = vadd.f32 %v1044_v63, %v1043_v42  ;;  %v995_v9 = vadd.f32 %v994_v6, %v993_v62 }
 0x2e9   : > { %v1046_v55 = vrot.slane %v1045_v0, 2  ;;  %v996_v1 = vrot.slane %v995_v9, 2 }
 0x2eb   : > { %v1047_v33 = vadd.f32 %v1046_v55, %v1045_v0  ;;  %v997_v11 = vadd.f32 %v996_v1, %v995_v9 }
 0x2ed   : > { %v998_v34 = vrot.slane %v997_v11, 1  ;;  %v1048_v13 = vrot.slane %v1047_v33, 1 }
 0x2ef   : > { %v999_v44 = vadd.f32 %v998_v34, %v997_v11  ;;  %v1049_v45 = vadd.f32 %v1048_v13, %v1047_v33 }
 0x2f1   : > { %1301 = vpush %v999_v44 }
 0x2f2   : > { %1303 = vpush %v1049_v45 }
 0x322   : > { %s1302_s7 = spop %1301 }
 0x323   : > { %v1054_v27 = vstv %s1302_s7  ;;  %s1304_s8 = spop %1303 }
 0x324   : > { %v1055_v32 = vstv %s1304_s8 }
 0x325   : > { %v1056_v50 = vsel %vm1053_vm9, %v1054_v27, %v1055_v32 }
 0x326   : > { %1057 = vst [vmem:[%s207_s5] sm:$0xff] %v1056_v50 }
 0x327   : > { %1446 = shalt.err (!%p1443_p3)
}
 0x328   : > { %s1447_s22 = scalar_lea.hbm %s2097_s11, 128  ;;  %s1451_s28 = scalar_lea.hbm %s2136_s4, 256 }
 0x329   : > { %p1448_p4 = scmp.ne.s32.totalorder %s2097_s11, %s1447_s22  ;;  %p1452_p9 = scmp.lt.s32.totalorder %s2097_s11, %s2136_s4 }
 0x32a   : > { %p1453_p10 = scmp.lt.s32.totalorder %s1451_s28, %s1447_s22 }
 0x32b   : > { %p1449_p7 = pnand %p1448_p4, %p1562_p5 }
 0x32c   : > { %p1454_p11 = por %p1453_p10, %p1452_p9 }
 0x32d   : > { %p1450_p8 = pneg %p1449_p7 }
 0x32f   : > { %p1455_p12 = pnand %p1454_p11, %p1450_p8 }
 0x331   : > { %1458 = shalt.err (!%p1455_p12)
}
 0x332   : > { %1305 = dma.vmem_to_hbm [thread:$0]  (%p1562_p5), %s1073_s6, 128, %s2097_s11, %s1059_s12  }
 0x333 PF: > { %p1311_p13 = scmp.ge.s32.totalorder %s1493_s18, 2  ;;  %s1084_s5 = sand.u32 1, %s1481_s15  }
 0x334   : > { %s1085_s7 = scalar_lea.sflag [#allocation3], %s1084_s5 }
 0x335   : > { %p1308_p0 = pnand %p1311_p13, %p1566_p6 }
 0x337   : > { %p1309_p1 = pneg %p1308_p0 }
 0x339   : > { %1476 = dma.done.wait (%p1309_p1), %s1085_s7, 128  }
 0x33a   : > { %1478 = vsyncadd (%p1309_p1), %s1085_s7, 4294967168  ;;  %p14_p2 = scmp.ge.s32.totalorder %s1549_s21, 4   ;;  %s2139_s15 = smov %s1485_s16 }
 0x33b   : > { %s2140_s16 = smov %s1489_s17  ;;  %s2141_s17 = smov %s1560_s24 }
 0x33c   : > { %s2142_s18 = smov %s1549_s21  ;;  %16 = sbr.rel (!%p14_p2) target bundleno = 3 (0x3), region = 74 }
 0x341   :  { %1090 = vsyncpa [#allocation3], 1 }
 0x342   :  { %1092 = vsyncpa [#allocation3 + $0x1], 1 }

</bundles_post_ra>
